<compile_context>
chip_gen: v6e
topology: v6e:2x2x1
jax: 0.10.0
libtpu: 0.0.40
codegen_flags: <defaults>
</compile_context>

<pallas_src>
import jax
import jax.numpy as jnp
from jax.experimental import pallas as pl
from jax.experimental.pallas import tpu as pltpu


def _silu_linear_kernel(x_ref, w_ref, b_ref, out_ref):
    # x_ref  : (tmR, 128)   packed input rows (16 logical rows per lane-row)
    # w_ref  : (128, 128)   block-diagonal replication of W.T (resident)
    # b_ref  : (1, 128)     bias tiled 16x (resident)
    # out_ref: (3, tmR, 128) packed [v3, v2, v1]
    v1 = jnp.dot(x_ref[...], w_ref[...], preferred_element_type=jnp.float32)
    v1 = v1 + b_ref[...]
    # exp goes to the EUP slot; exact reciprocal keeps 1e-5 accuracy and the
    # whole activation hides under DMA (kernel is HBM-bound).
    v2 = 1.0 / (1.0 + jnp.exp(-v1))
    v3 = v1 * v2
    out_ref[0] = v3.astype(out_ref.dtype)
    out_ref[1] = v2.astype(out_ref.dtype)
    out_ref[2] = v1.astype(out_ref.dtype)


def _round_up(a, b):
    return ((a + b - 1) // b) * b


def model_forward(x, weight, bias, *, tile_rows=4096):
    """Pallas equivalent of Model.forward; returns (v3, v2, v1)."""
    orig_shape = x.shape
    f_in = orig_shape[-1]
    f_out = weight.shape[0]
    assert 128 % f_in == 0 and f_in == weight.shape[1]
    pack = 128 // f_in                      # logical rows packed per lane-row
    lanes_in = pack * f_in                  # 128
    lanes_out = pack * f_out                # 128 for the 8->8 linear

    # Flatten leading dims; pack rows onto the 128-lane axis (zero-copy when
    # M is already a multiple of `pack`).
    x2d = x.reshape(-1, f_in)
    M = x2d.shape[0]
    pad_rows = (-M) % pack                  # at most pack-1 rows: negligible
    if pad_rows:
        x2d = jnp.pad(x2d, ((0, pad_rows), (0, 0)))
    MR = (M + pad_rows) // pack
    x_packed = x2d.reshape(MR, lanes_in)

    # Block-diagonal weight (16 copies of W.T) and tiled bias, built once.
    w_big = jnp.kron(jnp.eye(pack, dtype=weight.dtype), weight.T)   # (128,128)
    b_big = jnp.tile(bias, pack).reshape(1, lanes_out)              # (1,128)

    # Adaptive row-tile: whole array in one block when small (block == full
    # dim is always legal); otherwise big sublane-aligned tiles with >=4 grid
    # steps when the input is large enough (better 2-TC sharding on v7x).
    if MR <= tile_rows:
        tmR = MR
    else:
        tmR = min(int(tile_rows), max(512, _round_up(pl.cdiv(MR, 4), 8)))
        tmR = _round_up(tmR, 8)
    grid_m = pl.cdiv(MR, tmR)

    packed = pl.pallas_call(
        _silu_linear_kernel,
        out_shape=jax.ShapeDtypeStruct((3, MR, lanes_out), x.dtype),
        grid_spec=pltpu.PrefetchScalarGridSpec(
            num_scalar_prefetch=0,
            grid=(grid_m,),
            in_specs=[
                pl.BlockSpec((tmR, lanes_in), lambda i: (i, 0)),       # x tile
                pl.BlockSpec((lanes_in, lanes_out), lambda i: (0, 0)),  # weight
                pl.BlockSpec((1, lanes_out), lambda i: (0, 0)),         # bias
            ],
            out_specs=pl.BlockSpec((3, tmR, lanes_out), lambda i: (0, i, 0)),
        ),
        compiler_params=pltpu.CompilerParams(
            dimension_semantics=("parallel",),
            # Double-buffered footprint at tmR=4096 is ~16 MiB; 48 MiB leaves
            # headroom on every generation (incl. v7x's 64 MiB VMEM).
            vmem_limit_bytes=48 * 1024 * 1024,
        ),
    )(x_packed, w_big, b_big)

    out_nd = orig_shape[:-1] + (f_out,)

    def _unpack(slab):
        flat = slab.reshape(MR * pack, f_out)       # free reshape (row order kept)
        if pad_rows:
            flat = flat[:M]
        return flat.reshape(out_nd)

    v3 = _unpack(packed[0])
    v2 = _unpack(packed[1])
    v1 = _unpack(packed[2])
    return v3, v2, v1


if __name__ == "__main__":
    key = jax.random.PRNGKey(0)
    kx, kw, kb = jax.random.split(key, 3)

    # Small shapes consistent with the module: Linear(8, 8) acts on the last
    # dim. M = 2*4*40 = 320 rows -> exercises the packed-row layout.
    B, C, H, F = 2, 4, 40, 8
    x1 = jax.random.normal(kx, (B, C, H, F), dtype=jnp.float32)

    # Deterministic params (mimics nn.Linear uniform(-1/sqrt(8), 1/sqrt(8))).
    bound = 1.0 / (8.0 ** 0.5)
    weight = jax.random.uniform(kw, (8, 8), minval=-bound, maxval=bound,
                                dtype=jnp.float32)
    bias = jax.random.uniform(kb, (8,), minval=-bound, maxval=bound,
                              dtype=jnp.float32)

    v3, v2, v1 = model_forward(x1, weight, bias)
    jax.block_until_ready((v3, v2, v1))

    # Sanity check against a plain-JAX reference.
    v1_ref = x1 @ weight.T + bias
    v2_ref = jax.nn.sigmoid(v1_ref)
    v3_ref = v1_ref * v2_ref
    assert jnp.allclose(v1, v1_ref, atol=1e-5)
    assert jnp.allclose(v2, v2_ref, atol=1e-5)
    assert jnp.allclose(v3, v3_ref, atol=1e-5)

    print("KERNEL_OK")
</pallas_src>

<mosaic_0001>
module attributes {stable_mosaic.version = 11 : i64} {
  func.func @_silu_linear_kernel(%arg0: i32, %arg1: memref<20x128xf32, #tpu.memory_space<vmem>>, %arg2: memref<128x128xf32, #tpu.memory_space<vmem>>, %arg3: memref<1x128xf32, #tpu.memory_space<vmem>>, %arg4: memref<3x20x128xf32, #tpu.memory_space<vmem>>) attributes {dimension_semantics = [#tpu.dimension_semantics<parallel>], iteration_bounds = array<i64: 1>, scalar_prefetch = 0 : i64, scratch_operands = 0 : i64, tpu.core_type = #tpu.core_type<tc>, window_params = [{transform_indices = @transform_0, window_bounds = array<i64: 20, 128>}, {pipeline_mode = #tpu.pipeline_mode<synchronous>, transform_indices = @transform_1, window_bounds = array<i64: 128, 128>}, {pipeline_mode = #tpu.pipeline_mode<synchronous>, transform_indices = @transform_2, window_bounds = array<i64: 1, 128>}, {transform_indices = @transform_3, window_bounds = array<i64: 3, 20, 128>}]} {
    %c0 = arith.constant 0 : index
    %c0_0 = arith.constant 0 : index
    %0 = vector.load %arg1[%c0, %c0_0] : memref<20x128xf32, #tpu.memory_space<vmem>>, vector<20x128xf32>
    %c0_1 = arith.constant 0 : index
    %c0_2 = arith.constant 0 : index
    %1 = vector.load %arg2[%c0_1, %c0_2] : memref<128x128xf32, #tpu.memory_space<vmem>>, vector<128x128xf32>
    %cst = arith.constant dense<0.000000e+00> : vector<20x128xf32>
    %2 = tpu.matmul %0, %1, %cst {dimension_numbers = #tpu.dot_dimension_numbers<[1], [0], [0], [1], [0, 0, 1, 1], [], []>} : vector<20x128xf32>, vector<128x128xf32>, vector<20x128xf32> -> vector<20x128xf32>
    %c0_3 = arith.constant 0 : index
    %c0_4 = arith.constant 0 : index
    %3 = vector.load %arg3[%c0_3, %c0_4] : memref<1x128xf32, #tpu.memory_space<vmem>>, vector<1x128xf32>
    %4 = vector.broadcast %3 : vector<1x128xf32> to vector<20x128xf32>
    %5 = arith.addf %2, %4 : vector<20x128xf32>
    %cst_5 = arith.constant 0.000000e+00 : f32
    %6 = vector.broadcast %cst_5 : f32 to vector<20x128xf32>
    %7 = arith.subf %6, %5 : vector<20x128xf32>
    %8 = math.exp %7 : vector<20x128xf32>
    %cst_6 = arith.constant 1.000000e+00 : f32
    %9 = vector.broadcast %cst_6 : f32 to vector<20x128xf32>
    %10 = arith.addf %9, %8 : vector<20x128xf32>
    %cst_7 = arith.constant 1.000000e+00 : f32
    %11 = vector.broadcast %cst_7 : f32 to vector<20x128xf32>
    %12 = arith.divf %11, %10 : vector<20x128xf32>
    %13 = arith.mulf %5, %12 : vector<20x128xf32>
    %c0_8 = arith.constant 0 : index
    %c0_9 = arith.constant 0 : index
    %c0_10 = arith.constant 0 : index
    %14 = vector.load %arg4[%c0_8, %c0_9, %c0_10] : memref<3x20x128xf32, #tpu.memory_space<vmem>>, vector<1x20x128xf32>
    %15 = vector.shape_cast %14 : vector<1x20x128xf32> to vector<20x128xf32>
    %16 = vector.shape_cast %13 : vector<20x128xf32> to vector<1x20x128xf32>
    tpu.vector_store %arg4[%c0_8, %c0_9, %c0_10], %16 {strides = array<i32>} : memref<3x20x128xf32, #tpu.memory_space<vmem>>, vector<1x20x128xf32>,
    %c1 = arith.constant 1 : index
    %c0_11 = arith.constant 0 : index
    %c0_12 = arith.constant 0 : index
    %17 = vector.load %arg4[%c1, %c0_11, %c0_12] : memref<3x20x128xf32, #tpu.memory_space<vmem>>, vector<1x20x128xf32>
    %18 = vector.shape_cast %17 : vector<1x20x128xf32> to vector<20x128xf32>
    %19 = vector.shape_cast %12 : vector<20x128xf32> to vector<1x20x128xf32>
    tpu.vector_store %arg4[%c1, %c0_11, %c0_12], %19 {strides = array<i32>} : memref<3x20x128xf32, #tpu.memory_space<vmem>>, vector<1x20x128xf32>,
    %c2 = arith.constant 2 : index
    %c0_13 = arith.constant 0 : index
    %c0_14 = arith.constant 0 : index
    %20 = vector.load %arg4[%c2, %c0_13, %c0_14] : memref<3x20x128xf32, #tpu.memory_space<vmem>>, vector<1x20x128xf32>
    %21 = vector.shape_cast %20 : vector<1x20x128xf32> to vector<20x128xf32>
    %22 = vector.shape_cast %5 : vector<20x128xf32> to vector<1x20x128xf32>
    tpu.vector_store %arg4[%c2, %c0_13, %c0_14], %22 {strides = array<i32>} : memref<3x20x128xf32, #tpu.memory_space<vmem>>, vector<1x20x128xf32>,
    return
  }
  func.func @transform_0(%arg0: i32) -> (i32, i32) {
    %c0_i32 = arith.constant 0 : i32
    %c0_i32_0 = arith.constant 0 : i32
    return %arg0, %c0_i32 : i32, i32
  }
  func.func @transform_1(%arg0: i32) -> (i32, i32) {
    %c0_i32 = arith.constant 0 : i32
    %c0_i32_0 = arith.constant 0 : i32
    %c0_i32_1 = arith.constant 0 : i32
    return %c0_i32, %c0_i32_0 : i32, i32
  }
  func.func @transform_2(%arg0: i32) -> (i32, i32) {
    %c0_i32 = arith.constant 0 : i32
    %c0_i32_0 = arith.constant 0 : i32
    %c0_i32_1 = arith.constant 0 : i32
    return %c0_i32, %c0_i32_0 : i32, i32
  }
  func.func @transform_3(%arg0: i32) -> (i32, i32, i32) {
    %c0_i32 = arith.constant 0 : i32
    %c0_i32_0 = arith.constant 0 : i32
    %c0_i32_1 = arith.constant 0 : i32
    return %c0_i32, %arg0, %c0_i32_0 : i32, i32, i32
  }
}

</mosaic_0001>

<bundles_post_ra>
// kernel: tpu_custom_call.1
= control target key start
LH: loop header
LB: loop body
LE: loop exit
PB: predicated region body
PF: predicated region fallthrough
CT: control target
= control target key end

     0   :  { %8 = vsyncpa [#allocation3], 0  ;;  %s463_s0 = inlined_call_operand.hbm [shape: f32[20,128], index: 0, kind: input, shape index: {}]   ;;  %s464_s1 = inlined_call_operand.hbm [shape: f32[128,128], index: 1, kind: input, shape index: {}]   ;;  %s465_s2 = inlined_call_operand.vmem [shape: f32[1,128], index: 2, kind: input, shape index: {}]   ;;  %s466_s3 = inlined_call_operand.hbm [shape: f32[3,20,128], index: 3, kind: output, shape index: {}]  }
   0x1   :  { %9 = vsyncpa [#allocation6], 0 }
   0x2   :  { %10 = vsyncpa [#allocation4], 0  ;;  %s377_s12 = smov [#allocation2]  }
   0x3   :  { %s16_s13 = sshll.u32 %s377_s12, 4  ;;  %s17_s13 = int_to_ptr.vmem [resolvable:$true] %s16_s13 }
   0x4   :  { %s319_s14 = scalar_lea.vmem %s17_s13, 384  ;;  %p324_p1 = scmp.lt.s32.totalorder %s17_s13, %s17_s13 }
   0x5   :  { %p320_p0 = scmp.ne.s32.totalorder %s17_s13, %s319_s14  ;;  %p325_p2 = scmp.lt.s32.totalorder %s319_s14, %s319_s14 }
   0x7   :  { %p326_p3 = por %p325_p2, %p324_p1 }
   0x9   :  { %p327_p4 = pnand %p326_p3, %p320_p0 }
   0xb   :  { %330 = shalt.err (!%p327_p4)
}
   0xc   :  { %s378_s15 = smov 128   ;;  %s379_s16 = smov 8  }
   0xd   :  { %22 = dma.hbm_to_vmem [thread:$0]  %s463_s0, 384, %s17_s13, [#allocation3], %s378_s15, %s378_s15, %s379_s16  }
   0xe   :  { %s380_s19 = smov [#allocation5]  }
   0xf   :  { %s28_s20 = sshll.u32 %s380_s19, 4  ;;  %s29_s20 = int_to_ptr.vmem [resolvable:$true] %s28_s20 }
  0x10   :  { %s339_s21 = scalar_lea.vmem %s29_s20, 2048  ;;  %p344_p6 = scmp.lt.s32.totalorder %s29_s20, %s29_s20 }
  0x11   :  { %p340_p5 = scmp.ne.s32.totalorder %s29_s20, %s339_s21  ;;  %p345_p7 = scmp.lt.s32.totalorder %s339_s21, %s339_s21 }
  0x13   :  { %p346_p8 = por %p345_p7, %p344_p6 }
  0x15   :  { %p347_p9 = pnand %p346_p8, %p340_p5 }
  0x17   :  { %350 = shalt.err (!%p347_p9)
}
  0x18   :  { %34 = dma.hbm_to_vmem [thread:$0]  %s464_s1, 2048, %s29_s20, [#allocation6], %s378_s15, %s378_s15, %s379_s16  }
  0x19   :  { %371 = dma.done.wait [#allocation3], 384  }
  0x1a   :  { %372 = vsyncadd [#allocation3], 4294966912 }
  0x1b   :  { %373 = dma.done.wait [#allocation6], 2048  }
  0x1c   :  { %374 = vsyncadd [#allocation6], 4294965248  ;;  %v381_v0 = vmov 0.0   ;;  %vm382_vm0 = vmmov 0   ;;  %v61_v1 = vld [vmem:[#allocation5 + $0x78] sm:$0xff]  ;;  %v60_v2 = vld [vmem:[#allocation5 + $0x70] sm:$0xff] }
  0x1d   :  { %219 = vmatprep.subr.mxu0 %v381_v0  ;;  %260 = vmatprep.subr.mxu1 %v381_v0  ;;  %v59_v3 = vld [vmem:[#allocation5 + $0x68] sm:$0xff]  ;;  %v58_v4 = vld [vmem:[#allocation5 + $0x60] sm:$0xff]  ;;  %v57_v5 = vld [vmem:[#allocation5 + $0x58] sm:$0xff] }
  0x1e   :  { %251 = vmatprep.mubr.msk.f32.mxu0 %vm382_vm0, %v381_v0  ;;  %254 = vmatprep.mubr.msk.f32.mxu1 %vm382_vm0, %v381_v0  ;;  %v56_v6 = vld [vmem:[#allocation5 + $0x50] sm:$0xff]  ;;  %v55_v7 = vld [vmem:[#allocation5 + $0x48] sm:$0xff]  ;;  %v54_v8 = vld [vmem:[#allocation5 + $0x40] sm:$0xff] }
  0x1f   :  { %220 = vmatpush3.msra.mxu0 %v61_v1  ;;  %276 = vmatpush3.msra.mxu1 %v61_v1  ;;  %v53_v9 = vld [vmem:[#allocation5 + $0x38] sm:$0xff]  ;;  %v52_v10 = vld [vmem:[#allocation5 + $0x30] sm:$0xff]  ;;  %v51_v11 = vld [vmem:[#allocation5 + $0x28] sm:$0xff] }
  0x20   :  { %221 = vmatprep.subr.mxu0 %v381_v0  ;;  %261 = vmatprep.subr.mxu1 %v381_v0  ;;  %v50_v12 = vld [vmem:[#allocation5 + $0x20] sm:$0xff]  ;;  %v49_v13 = vld [vmem:[#allocation5 + $0x18] sm:$0xff]  ;;  %v48_v14 = vld [vmem:[#allocation5 + $0x10] sm:$0xff] }
  0x21   :  { %222 = vmatpush3.msra.mxu0 %v60_v2  ;;  %277 = vmatpush3.msra.mxu1 %v60_v2  ;;  %v47_v15 = vld [vmem:[#allocation5 + $0x8] sm:$0xff]  ;;  %v46_v16 = vld [vmem:[#allocation5] sm:$0xff]  ;;  %v44_v18 = vld [vmem:[#allocation2 + $0x8] sm:$0xff] }
  0x22   :  { %223 = vmatprep.subr.mxu0 %v381_v0  ;;  %262 = vmatprep.subr.mxu1 %v381_v0  ;;  %v43_v17 = vld [vmem:[#allocation2] sm:$0xff]  ;;  %v45_v19 = vld [vmem:[#allocation2 + $0x10] sm:$0xf] }
  0x23   :  { %224 = vmatpush3.msra.mxu0 %v59_v3  ;;  %278 = vmatpush3.msra.mxu1 %v59_v3  ;;  %v199_v20 = vld [vmem:[%s465_s2] ss:$0 sm:$0xff]  ;;  %s383_s2 = smov [#allocation7]  }
  0x24   :  { %225 = vmatprep.subr.mxu0 %v381_v0  ;;  %263 = vmatprep.subr.mxu1 %v381_v0  ;;  %s186_s24 = sshll.u32 %s383_s2, 4  ;;  %s187_s24 = int_to_ptr.vmem [resolvable:$true] %s186_s24 }
  0x25   :  { %226 = vmatpush3.msra.mxu0 %v58_v4  ;;  %279 = vmatpush3.msra.mxu1 %v58_v4  ;;  %s351_s25 = scalar_lea.vmem %s187_s24, 1152  ;;  %p356_p11 = scmp.lt.s32.totalorder %s187_s24, %s187_s24 }
  0x26   :  { %227 = vmatprep.subr.mxu0 %v381_v0  ;;  %264 = vmatprep.subr.mxu1 %v381_v0  ;;  %p352_p10 = scmp.ne.s32.totalorder %s187_s24, %s351_s25  ;;  %p357_p12 = scmp.lt.s32.totalorder %s351_s25, %s351_s25 }
  0x27   :  { %228 = vmatpush3.msra.mxu0 %v57_v5  ;;  %280 = vmatpush3.msra.mxu1 %v57_v5 }
  0x28   :  { %229 = vmatprep.subr.mxu0 %v381_v0  ;;  %265 = vmatprep.subr.mxu1 %v381_v0  ;;  %p358_p13 = por %p357_p12, %p356_p11 }
  0x29   :  { %230 = vmatpush3.msra.mxu0 %v56_v6  ;;  %281 = vmatpush3.msra.mxu1 %v56_v6 }
  0x2a   :  { %231 = vmatprep.subr.mxu0 %v381_v0  ;;  %266 = vmatprep.subr.mxu1 %v381_v0  ;;  %p359_p0 = pnand %p358_p13, %p352_p10 }
  0x2b   :  { %232 = vmatpush3.msra.mxu0 %v55_v7  ;;  %282 = vmatpush3.msra.mxu1 %v55_v7 }
  0x2c   :  { %233 = vmatprep.subr.mxu0 %v381_v0  ;;  %267 = vmatprep.subr.mxu1 %v381_v0 }
  0x2d   :  { %234 = vmatpush3.msra.mxu0 %v54_v8  ;;  %283 = vmatpush3.msra.mxu1 %v54_v8 }
  0x2e   :  { %235 = vmatprep.subr.mxu0 %v381_v0  ;;  %268 = vmatprep.subr.mxu1 %v381_v0 }
  0x2f   :  { %236 = vmatpush3.msra.mxu0 %v53_v9  ;;  %284 = vmatpush3.msra.mxu1 %v53_v9 }
  0x30   :  { %237 = vmatprep.subr.mxu0 %v381_v0  ;;  %269 = vmatprep.subr.mxu1 %v381_v0 }
  0x31   :  { %238 = vmatpush3.msra.mxu0 %v52_v10  ;;  %285 = vmatpush3.msra.mxu1 %v52_v10 }
  0x32   :  { %239 = vmatprep.subr.mxu0 %v381_v0  ;;  %270 = vmatprep.subr.mxu1 %v381_v0 }
  0x33   :  { %240 = vmatpush3.msra.mxu0 %v51_v11  ;;  %286 = vmatpush3.msra.mxu1 %v51_v11 }
  0x34   :  { %241 = vmatprep.subr.mxu0 %v381_v0  ;;  %271 = vmatprep.subr.mxu1 %v381_v0 }
  0x35   :  { %242 = vmatpush3.msra.mxu0 %v50_v12  ;;  %287 = vmatpush3.msra.mxu1 %v50_v12 }
  0x36   :  { %243 = vmatprep.subr.mxu0 %v381_v0  ;;  %272 = vmatprep.subr.mxu1 %v381_v0 }
  0x37   :  { %244 = vmatpush3.msra.mxu0 %v49_v13  ;;  %288 = vmatpush3.msra.mxu1 %v49_v13 }
  0x38   :  { %245 = vmatprep.subr.mxu0 %v381_v0  ;;  %273 = vmatprep.subr.mxu1 %v381_v0 }
  0x39   :  { %246 = vmatpush3.msra.mxu0 %v48_v14  ;;  %289 = vmatpush3.msra.mxu1 %v48_v14 }
  0x3a   :  { %247 = vmatprep.subr.mxu0 %v381_v0  ;;  %274 = vmatprep.subr.mxu1 %v381_v0 }
  0x3b   :  { %248 = vmatpush3.msra.mxu0 %v47_v15  ;;  %290 = vmatpush3.msra.mxu1 %v47_v15 }
  0x3c   :  { %249 = vmatprep.subr.mxu0 %v381_v0  ;;  %275 = vmatprep.subr.mxu1 %v381_v0 }
  0x3d   :  { %250 = vmatpush3.msra.mxu0 %v46_v16  ;;  %291 = vmatpush3.msra.mxu1 %v46_v16 }
  0x3e   :  { %252 = vmatmul.mubr.f32.vlgmr.msra.gmra.mxu0 %v43_v17  ;;  %255 = vmatmul.mubr.f32.vlgmr.msra.gmra.mxu1 %v44_v18 }
  0x3f   :  { %257 = vmatprep.mubr.msk.f32.mxu1 %vm382_vm0, %v381_v0 }
  0x42   :  { %258 = vmatmul.mubr.f32.gmra.mxu1 %v45_v19 }
  0xfe   :  { %v135_v21 = vpop.f32.mrf.mxu0  ;;  %v140_v22 = vpop.f32.mrf.mxu1 }
  0xff   :  { %v136_v23 = vadd.f32 %v199_v20, %v135_v21  ;;  %v141_v24 = vadd.f32 %v199_v20, %v140_v22 }
 0x100   :  { %v256_v25 = vpop.f32.mrf.mxu1  ;;  %v253_v26 = vpop.f32.mrf.mxu0 }
 0x101   :  { %v149_v27 = vsub.f32 0.0, %v136_v23  ;;  %178 = vst [vmem:[#allocation7 + $0x30] sm:$0xff] %v136_v23  ;;  %v150_v28 = vsub.f32 0.0, %v141_v24  ;;  %179 = vst [vmem:[#allocation7 + $0x38] sm:$0xff] %v141_v24 }
 0x102   :  { %v145_v29 = vpop.f32.mrf.mxu1 }
 0x103   :  { %v152_v30 = vmul.f32 1.442695, %v149_v27  ;;  %v154_v31 = vmul.f32 1.442695, %v150_v28  ;;  %v146_v32 = vadd.f32 %v199_v20, %v145_v29 }
 0x104   :  { %v259_v33 = vpop.f32.mrf.mxu1 }
 0x105   :  { %299 = vpow2.f32 %v152_v30  ;;  %v151_v34 = vsub.f32 0.0, %v146_v32  ;;  %180 = vst [vmem:[#allocation7 + $0x40] sm:$0xf] %v146_v32 }
 0x106   :  { %301 = vpow2.f32 %v154_v31 }
 0x107   :  { %v156_v35 = vmul.f32 1.442695, %v151_v34 }
 0x109   :  { %303 = vpow2.f32 %v156_v35 }
 0x112   :  { %v300_v36 = vpop.eup %299 }
 0x113   :  { %v302_v37 = vpop.eup %301  ;;  %v158_v38 = vadd.f32 1.0, %v300_v36 }
 0x114   :  { %v159_v39 = vadd.f32 1.0, %v302_v37 }
 0x115   :  { %305 = vrcp.f32 %v158_v38 }
 0x116   :  { %v304_v40 = vpop.eup %303  ;;  %307 = vrcp.f32 %v159_v39 }
 0x117   :  { %v160_v41 = vadd.f32 1.0, %v304_v40 }
 0x119   :  { %309 = vrcp.f32 %v160_v41 }
 0x122   :  { %v306_v42 = vpop.eup %305 }
 0x123   :  { %v308_v43 = vpop.eup %307  ;;  %v167_v44 = vmul.f32 %v306_v42, %v136_v23  ;;  %174 = vst [vmem:[#allocation7 + $0x18] sm:$0xff] %v306_v42 }
 0x124   :  { %v168_v45 = vmul.f32 %v308_v43, %v141_v24  ;;  %175 = vst [vmem:[#allocation7 + $0x20] sm:$0xff] %v308_v43 }
 0x125   :  { %170 = vst [vmem:[#allocation7] sm:$0xff] %v167_v44 }
 0x126   :  { %v310_v46 = vpop.eup %309  ;;  %171 = vst [vmem:[#allocation7 + $0x8] sm:$0xff] %v168_v45 }
 0x127   :  { %v169_v47 = vmul.f32 %v310_v46, %v146_v32  ;;  %176 = vst [vmem:[#allocation7 + $0x28] sm:$0xf] %v310_v46 }
 0x129   :  { %172 = vst [vmem:[#allocation7 + $0x10] sm:$0xf] %v169_v47 }
 0x12a   :  { %362 = shalt.err (!%p359_p0)
}
 0x12b   :  { %192 = dma.vmem_to_hbm [thread:$0]  %s187_s24, 1152, %s466_s3, [#allocation4], %s378_s15, %s378_s15, %s379_s16  }
 0x12c   :  { %375 = dma.done.wait [#allocation4], 1152  }
 0x12d   :  { %376 = vsyncadd [#allocation4], 4294966144 }
 0x12e   :  { %196 = vsyncpa [#allocation3], 1 }
 0x12f   :  { %197 = vsyncpa [#allocation6], 1 }
 0x130   :  { %198 = vsyncpa [#allocation4], 1 }

</bundles_post_ra>
